<compile_context>
chip_gen: v5e
topology: v5e:2x2
jax: 0.10.0
libtpu: 0.0.40
codegen_flags: <defaults>
</compile_context>

<pallas_src>
import jax
import jax.numpy as jnp
from jax.experimental import pallas as pl
from jax.experimental.pallas import tpu as pltpu


_OUT_PAD = 128   # lane-dense padded logits width; true logits are cols [0, 10)
_HID_PAD = 128   # layer-2 width padded 64 -> 128 for lane-dense intermediates


def _round_up(n, m):
    return ((n + m - 1) // m) * m


def _mlp_kernel(x_ref, w1_ref, b1_ref, w2_ref, b2_ref, w3_ref, b3_ref, o_ref):
    # In-kernel cast of the streamed f32 x tile to the MXU compute dtype
    # (bf16 by default).  Free VPU work; avoids a wrapper-side HBM pass.
    x = x_ref[...].astype(w1_ref.dtype)

    # Layer 1: (TB,784) @ (784,128) + (1,128) -> ReLU   (f32 accumulation)
    h1 = jnp.dot(x, w1_ref[...], preferred_element_type=jnp.float32)
    h1 = jnp.maximum(h1 + b1_ref[...], 0.0)

    # Layer 2: (TB,128) @ (128,128-padded) + (1,128) -> ReLU
    # (cols [64,128) of w2p/b2p are zero, so padded h2 cols are exactly 0)
    h2 = jnp.dot(h1.astype(w2_ref.dtype), w2_ref[...],
                 preferred_element_type=jnp.float32)
    h2 = jnp.maximum(h2 + b2_ref[...], 0.0)

    # Layer 3: (TB,128) @ (128,128-padded) + (1,128) -> logits in cols [0,10)
    o_ref[...] = (jnp.dot(h2.astype(w3_ref.dtype), w3_ref[...],
                          preferred_element_type=jnp.float32)
                  + b3_ref[...]).astype(o_ref.dtype)


def mnist_small_classifier_forward(x_nchw, params, *, block_b=2048,
                                   compute_dtype=jnp.bfloat16,
                                   logits_dtype=jnp.float32):
    """x_nchw: (B, 1, 28, 28). Returns logits (B, 10) in `logits_dtype`.

    compute_dtype=jnp.bfloat16 (default): bf16 MXU inputs, f32 accumulation
    (~1e-3 relative error vs. a pure-f32 reference).
    compute_dtype=jnp.float32: bit-accurate-ish f32 path (1e-4 agreement).
    """
    w1, b1, w2, b2, w3, b3 = params
    B = x_nchw.shape[0]
    n_out = w3.shape[1]   # 10
    n_hid = w2.shape[1]   # 64

    # nn.Flatten(): row-major flatten of (C,H,W).  Metadata-only reshape; the
    # input stays f32 in HBM and is cast to compute_dtype inside the kernel.
    x2d = x_nchw.reshape(B, -1)
    d_in = x2d.shape[1]   # 784

    # Weights -> compute dtype (tiny, one-time; DMA'd into VMEM once).
    w1c = w1.astype(compute_dtype)
    b1c = b1.astype(jnp.float32)
    # Layer-2 width padded 64 -> 128 (zero output cols of w2 and zero bias).
    w2p = (jnp.zeros((w2.shape[0], _HID_PAD), compute_dtype)
           .at[:, :n_hid].set(w2.astype(compute_dtype)))
    b2p = (jnp.zeros((1, _HID_PAD), jnp.float32)
           .at[:, :n_hid].set(b2.astype(jnp.float32)))
    # Layer 3: rows padded 64 -> 128 (match padded h2), cols 10 -> 128 so the
    # output writeback is lane-dense (unmasked vst).
    w3p = (jnp.zeros((_HID_PAD, _OUT_PAD), compute_dtype)
           .at[:w3.shape[0], :n_out].set(w3.astype(compute_dtype)))
    b3p = (jnp.zeros((1, _OUT_PAD), jnp.float32)
           .at[:, :n_out].set(b3.astype(jnp.float32)))

    # Batch tile: multiple of 16 sublanes (bf16 packs 2 rows per sublane).
    mult = 16
    tb = min(_round_up(block_b, mult), _round_up(B, mult))
    # v7x megacore: ensure >= 2 grid steps when the batch is big enough so
    # both TensorCores get work under dimension_semantics=("parallel",).
    if tb >= B and B > 2 * mult:
        tb = min(tb, _round_up(-(-B // 2), mult))
    grid = (pl.cdiv(B, tb),)   # partial edge block handles B % tb != 0

    # x / output are batch-tiled (double-buffered by Pallas); weights & biases
    # use constant index maps -> resident in VMEM across all batch tiles.
    x_spec = pl.BlockSpec((tb, d_in), lambda i: (i, 0))
    const = lambda a: pl.BlockSpec(a.shape, lambda i: (0, 0))
    out_spec = pl.BlockSpec((tb, _OUT_PAD), lambda i: (i, 0))

    out = pl.pallas_call(
        _mlp_kernel,
        out_shape=jax.ShapeDtypeStruct((B, _OUT_PAD), logits_dtype),
        grid=grid,
        in_specs=[x_spec, const(w1c), const(b1c), const(w2p), const(b2p),
                  const(w3p), const(b3p)],
        out_specs=out_spec,
        compiler_params=pltpu.CompilerParams(
            dimension_semantics=("parallel",),          # megacore on v7x
            vmem_limit_bytes=32 * 1024 * 1024),         # fits TB=2048 f32 x
    )(x2d, w1c, b1c, w2p, b2p, w3p, b3p)

    return out[:, :n_out]


def init_params(key):
    """Deterministic synthetic parameters with the module's shapes.

    torch nn.Linear stores W as (out, in); we store the transpose (in, out)
    so the kernel can do x @ W directly.
    """
    k1, k2, k3, k4, k5, k6 = jax.random.split(key, 6)

    def uniform_fan_in(k, shape, fan_in):
        bound = 1.0 / (fan_in ** 0.5)
        return jax.random.uniform(k, shape, jnp.float32, -bound, bound)

    w1 = uniform_fan_in(k1, (784, 128), 784)   # Linear(784,128).weight.T
    b1 = uniform_fan_in(k2, (1, 128), 784)     # Linear(784,128).bias
    w2 = uniform_fan_in(k3, (128, 64), 128)    # Linear(128,64).weight.T
    b2 = uniform_fan_in(k4, (1, 64), 128)      # Linear(128,64).bias
    w3 = uniform_fan_in(k5, (64, 10), 64)      # Linear(64,10).weight.T
    b3 = uniform_fan_in(k6, (1, 10), 64)       # Linear(64,10).bias
    return (w1, b1, w2, b2, w3, b3)


def _reference_forward(x_nchw, params):
    w1, b1, w2, b2, w3, b3 = params
    x = x_nchw.reshape(x_nchw.shape[0], -1).astype(jnp.float32)
    h1 = jnp.maximum(x @ w1 + b1, 0.0)
    h2 = jnp.maximum(h1 @ w2 + b2, 0.0)
    return h2 @ w3 + b3


if __name__ == "__main__":
    key = jax.random.PRNGKey(0)
    kx, kp = jax.random.split(key)
    params = init_params(kp)

    # --- Test 1: default bf16 MXU path (loose tolerance vs f32 reference). ---
    B = 8
    x = jax.random.normal(kx, (B, 1, 28, 28), dtype=jnp.float32)
    logits_bf16 = jax.block_until_ready(
        mnist_small_classifier_forward(x, params))
    ref = _reference_forward(x, params)
    assert logits_bf16.shape == (B, 10)
    assert logits_bf16.dtype == jnp.float32
    assert jnp.allclose(logits_bf16, ref, atol=5e-2, rtol=5e-2)

    # --- Test 2: f32 path, tight tolerance (exact module semantics). ---
    logits_f32 = jax.block_until_ready(
        mnist_small_classifier_forward(x, params,
                                       compute_dtype=jnp.float32))
    assert jnp.allclose(logits_f32, ref, atol=1e-4, rtol=1e-4)

    # --- Test 3: non-divisible batch, >=2-tile megacore split, partial tail
    #     (f32 for a tight check; no jnp.pad path, edge block handled). ---
    B3 = 100
    x3 = jax.random.normal(jax.random.PRNGKey(1), (B3, 1, 28, 28),
                           dtype=jnp.float32)
    logits3 = jax.block_until_ready(
        mnist_small_classifier_forward(x3, params,
                                       compute_dtype=jnp.float32))
    ref3 = _reference_forward(x3, params)
    assert logits3.shape == (B3, 10)
    assert jnp.allclose(logits3, ref3, atol=1e-4, rtol=1e-4)

    # --- Test 4: explicit multi-tile with a tiny block and a ragged tail,
    #     default bf16 path. ---
    B4 = 40
    x4 = jax.random.normal(jax.random.PRNGKey(2), (B4, 1, 28, 28),
                           dtype=jnp.float32)
    logits4 = jax.block_until_ready(
        mnist_small_classifier_forward(x4, params, block_b=16))
    ref4 = _reference_forward(x4, params)
    assert logits4.shape == (B4, 10)
    assert jnp.allclose(logits4, ref4, atol=5e-2, rtol=5e-2)

    print("KERNEL_OK")
</pallas_src>

<mosaic_0001>
module attributes {stable_mosaic.version = 11 : i64} {
  func.func @_mlp_kernel(%arg0: i32, %arg1: memref<16x784xf32, #tpu.memory_space<vmem>>, %arg2: memref<784x128xbf16, #tpu.memory_space<vmem>>, %arg3: memref<1x128xf32, #tpu.memory_space<vmem>>, %arg4: memref<128x128xbf16, #tpu.memory_space<vmem>>, %arg5: memref<1x128xf32, #tpu.memory_space<vmem>>, %arg6: memref<128x128xbf16, #tpu.memory_space<vmem>>, %arg7: memref<1x128xf32, #tpu.memory_space<vmem>>, %arg8: memref<16x128xf32, #tpu.memory_space<vmem>>) attributes {dimension_semantics = [#tpu.dimension_semantics<parallel>], iteration_bounds = array<i64: 1>, scalar_prefetch = 0 : i64, scratch_operands = 0 : i64, tpu.core_type = #tpu.core_type<tc>, window_params = [{transform_indices = @transform_0, window_bounds = array<i64: 16, 784>}, {pipeline_mode = #tpu.pipeline_mode<synchronous>, transform_indices = @transform_1, window_bounds = array<i64: 784, 128>}, {pipeline_mode = #tpu.pipeline_mode<synchronous>, transform_indices = @transform_2, window_bounds = array<i64: 1, 128>}, {pipeline_mode = #tpu.pipeline_mode<synchronous>, transform_indices = @transform_3, window_bounds = array<i64: 128, 128>}, {pipeline_mode = #tpu.pipeline_mode<synchronous>, transform_indices = @transform_4, window_bounds = array<i64: 1, 128>}, {pipeline_mode = #tpu.pipeline_mode<synchronous>, transform_indices = @transform_5, window_bounds = array<i64: 128, 128>}, {pipeline_mode = #tpu.pipeline_mode<synchronous>, transform_indices = @transform_6, window_bounds = array<i64: 1, 128>}, {transform_indices = @transform_7, window_bounds = array<i64: 16, 128>}]} {
    %c0 = arith.constant 0 : index
    %c0_0 = arith.constant 0 : index
    %0 = vector.load %arg1[%c0, %c0_0] : memref<16x784xf32, #tpu.memory_space<vmem>>, vector<16x784xf32>
    %1 = arith.truncf %0 : vector<16x784xf32> to vector<16x784xbf16>
    %c0_1 = arith.constant 0 : index
    %c0_2 = arith.constant 0 : index
    %2 = vector.load %arg2[%c0_1, %c0_2] : memref<784x128xbf16, #tpu.memory_space<vmem>>, vector<784x128xbf16>
    %cst = arith.constant dense<0.000000e+00> : vector<16x128xf32>
    %3 = tpu.matmul %1, %2, %cst {dimension_numbers = #tpu.dot_dimension_numbers<[1], [0], [0], [1], [0, 0, 1, 1], [], []>} : vector<16x784xbf16>, vector<784x128xbf16>, vector<16x128xf32> -> vector<16x128xf32>
    %c0_3 = arith.constant 0 : index
    %c0_4 = arith.constant 0 : index
    %4 = vector.load %arg3[%c0_3, %c0_4] : memref<1x128xf32, #tpu.memory_space<vmem>>, vector<1x128xf32>
    %5 = vector.broadcast %4 : vector<1x128xf32> to vector<16x128xf32>
    %6 = arith.addf %3, %5 : vector<16x128xf32>
    %cst_5 = arith.constant 0.000000e+00 : f32
    %7 = vector.broadcast %cst_5 : f32 to vector<16x128xf32>
    %8 = arith.maximumf %6, %7 : vector<16x128xf32>
    %9 = arith.truncf %8 : vector<16x128xf32> to vector<16x128xbf16>
    %c0_6 = arith.constant 0 : index
    %c0_7 = arith.constant 0 : index
    %10 = vector.load %arg4[%c0_6, %c0_7] : memref<128x128xbf16, #tpu.memory_space<vmem>>, vector<128x128xbf16>
    %cst_8 = arith.constant dense<0.000000e+00> : vector<16x128xf32>
    %11 = tpu.matmul %9, %10, %cst_8 {dimension_numbers = #tpu.dot_dimension_numbers<[1], [0], [0], [1], [0, 0, 1, 1], [], []>} : vector<16x128xbf16>, vector<128x128xbf16>, vector<16x128xf32> -> vector<16x128xf32>
    %c0_9 = arith.constant 0 : index
    %c0_10 = arith.constant 0 : index
    %12 = vector.load %arg5[%c0_9, %c0_10] : memref<1x128xf32, #tpu.memory_space<vmem>>, vector<1x128xf32>
    %13 = vector.broadcast %12 : vector<1x128xf32> to vector<16x128xf32>
    %14 = arith.addf %11, %13 : vector<16x128xf32>
    %cst_11 = arith.constant 0.000000e+00 : f32
    %15 = vector.broadcast %cst_11 : f32 to vector<16x128xf32>
    %16 = arith.maximumf %14, %15 : vector<16x128xf32>
    %17 = arith.truncf %16 : vector<16x128xf32> to vector<16x128xbf16>
    %c0_12 = arith.constant 0 : index
    %c0_13 = arith.constant 0 : index
    %18 = vector.load %arg6[%c0_12, %c0_13] : memref<128x128xbf16, #tpu.memory_space<vmem>>, vector<128x128xbf16>
    %cst_14 = arith.constant dense<0.000000e+00> : vector<16x128xf32>
    %19 = tpu.matmul %17, %18, %cst_14 {dimension_numbers = #tpu.dot_dimension_numbers<[1], [0], [0], [1], [0, 0, 1, 1], [], []>} : vector<16x128xbf16>, vector<128x128xbf16>, vector<16x128xf32> -> vector<16x128xf32>
    %c0_15 = arith.constant 0 : index
    %c0_16 = arith.constant 0 : index
    %20 = vector.load %arg7[%c0_15, %c0_16] : memref<1x128xf32, #tpu.memory_space<vmem>>, vector<1x128xf32>
    %21 = vector.broadcast %20 : vector<1x128xf32> to vector<16x128xf32>
    %22 = arith.addf %19, %21 : vector<16x128xf32>
    %c0_17 = arith.constant 0 : index
    %c0_18 = arith.constant 0 : index
    %23 = vector.load %arg8[%c0_17, %c0_18] : memref<16x128xf32, #tpu.memory_space<vmem>>, vector<16x128xf32>
    tpu.vector_store %arg8[%c0_17, %c0_18], %22 {strides = array<i32>} : memref<16x128xf32, #tpu.memory_space<vmem>>, vector<16x128xf32>,
    return
  }
  func.func @transform_0(%arg0: i32) -> (i32, i32) {
    %c0_i32 = arith.constant 0 : i32
    %c0_i32_0 = arith.constant 0 : i32
    return %arg0, %c0_i32 : i32, i32
  }
  func.func @transform_1(%arg0: i32) -> (i32, i32) {
    %c0_i32 = arith.constant 0 : i32
    %c0_i32_0 = arith.constant 0 : i32
    %c0_i32_1 = arith.constant 0 : i32
    return %c0_i32, %c0_i32_0 : i32, i32
  }
  func.func @transform_2(%arg0: i32) -> (i32, i32) {
    %c0_i32 = arith.constant 0 : i32
    %c0_i32_0 = arith.constant 0 : i32
    %c0_i32_1 = arith.constant 0 : i32
    return %c0_i32, %c0_i32_0 : i32, i32
  }
  func.func @transform_3(%arg0: i32) -> (i32, i32) {
    %c0_i32 = arith.constant 0 : i32
    %c0_i32_0 = arith.constant 0 : i32
    %c0_i32_1 = arith.constant 0 : i32
    return %c0_i32, %c0_i32_0 : i32, i32
  }
  func.func @transform_4(%arg0: i32) -> (i32, i32) {
    %c0_i32 = arith.constant 0 : i32
    %c0_i32_0 = arith.constant 0 : i32
    %c0_i32_1 = arith.constant 0 : i32
    return %c0_i32, %c0_i32_0 : i32, i32
  }
  func.func @transform_5(%arg0: i32) -> (i32, i32) {
    %c0_i32 = arith.constant 0 : i32
    %c0_i32_0 = arith.constant 0 : i32
    %c0_i32_1 = arith.constant 0 : i32
    return %c0_i32, %c0_i32_0 : i32, i32
  }
  func.func @transform_6(%arg0: i32) -> (i32, i32) {
    %c0_i32 = arith.constant 0 : i32
    %c0_i32_0 = arith.constant 0 : i32
    %c0_i32_1 = arith.constant 0 : i32
    return %c0_i32, %c0_i32_0 : i32, i32
  }
  func.func @transform_7(%arg0: i32) -> (i32, i32) {
    %c0_i32 = arith.constant 0 : i32
    %c0_i32_0 = arith.constant 0 : i32
    return %arg0, %c0_i32 : i32, i32
  }
}

</mosaic_0001>

<bundles_post_ra>
// kernel: tpu_custom_call.1
= control target key start
LH: loop header
LB: loop body
LE: loop exit
PB: predicated region body
PF: predicated region fallthrough
CT: control target
= control target key end

     0   :  { %12 = vsyncpa [#allocation3], 0  ;;  %s1346_s0 = inlined_call_operand.hbm [shape: f32[8,784], index: 0, kind: input, shape index: {}]   ;;  %s1347_s1 = inlined_call_operand.hbm [shape: bf16[784,128], index: 1, kind: input, shape index: {}]   ;;  %s1348_s2 = inlined_call_operand.vmem [shape: f32[1,128], index: 2, kind: input, shape index: {}]   ;;  %s1349_s3 = inlined_call_operand.hbm [shape: bf16[128,128], index: 3, kind: input, shape index: {}]   ;;  %s1350_s4 = inlined_call_operand.vmem [shape: f32[1,128], index: 4, kind: input, shape index: {}]   ;;  %s1351_s5 = inlined_call_operand.hbm [shape: bf16[128,128], index: 5, kind: input, shape index: {}]   ;;  %s1352_s6 = inlined_call_operand.vmem [shape: f32[1,128], index: 6, kind: input, shape index: {}]   ;;  %s1353_s7 = inlined_call_operand.hbm [shape: f32[8,128], index: 7, kind: output, shape index: {}]  }
   0x1   :  { %13 = vsyncpa [#allocation6], 0 }
   0x2   :  { %14 = vsyncpa [#allocation9], 0 }
   0x3   :  { %15 = vsyncpa [#allocation4], 0  ;;  %s33_s26 = sshll.u32 %s1347_s1, 4  ;;  %s34_s26 = int_to_ptr.hbm [resolvable:$true] %s33_s26 }
   0x4   :  { %19 = vsyncadd [#allocation3], 896  ;;  %s1271_s27 = smov [#allocation5]   ;;  %s20_s8 = sshll.u32 %s1346_s0, 4  ;;  %s21_s8 = int_to_ptr.hbm [resolvable:$true] %s20_s8 }
   0x5   :  { %s35_s28 = sshll.u32 %s1271_s27, 4  ;;  %s1272_s9 = smov 64   ;;  %s36_s28 = int_to_ptr.vmem [resolvable:$true] %s35_s28 }
   0x6   :  { %s1273_s10 = smov 4   ;;  %s1274_s11 = smov [#allocation2]  }
   0x7   :  { %41 = dma.hbm_to_vmem [thread:$0]  %s34_s26, 6272, %s36_s28, [#allocation6], %s1272_s9, %s1272_s9, %s1273_s10  }
   0x8   :  { %s22_s12 = sshll.u32 %s1274_s11, 4  ;;  %s1275_s13 = smov 896   ;;  %s23_s12 = int_to_ptr.vmem [resolvable:$true] %s22_s12 }
   0x9   :  { %s1276_s14 = smov 56   ;;  %s48_s16 = sshll.u32 %s1349_s3, 4  ;;  %s49_s16 = int_to_ptr.hbm [resolvable:$true] %s48_s16 }
   0xa   :  { %28 = dma.hbm_to_vmem [thread:$0]  %s21_s8, 896, %s23_s12, [#allocation3], %s1275_s13, %s1275_s13, %s1276_s14  }
   0xb   :  { %s1277_s17 = smov [#allocation7]   ;;  %s63_s20 = sshll.u32 %s1351_s5, 4  ;;  %s64_s20 = int_to_ptr.hbm [resolvable:$true] %s63_s20 }
   0xc   :  { %s50_s18 = sshll.u32 %s1277_s17, 4  ;;  %s1278_s21 = smov [#allocation8]   ;;  %s51_s18 = int_to_ptr.vmem [resolvable:$true] %s50_s18 }
   0xd   :  { %56 = dma.hbm_to_vmem [thread:$0]  %s49_s16, 1024, %s51_s18, [#allocation6], %s1272_s9, %s1272_s9, %s1273_s10  }
   0xe   :  { %s65_s22 = sshll.u32 %s1278_s21, 4  ;;  %s66_s22 = int_to_ptr.vmem [resolvable:$true] %s65_s22 }
   0xf   :  { %71 = dma.hbm_to_vmem [thread:$0]  %s64_s20, 1024, %s66_s22, [#allocation9], %s1272_s9, %s1272_s9, %s1273_s10  }
  0x10   :  { %1263 = dma.done.wait [#allocation3], 1792  }
  0x11   :  { %1264 = vsyncadd [#allocation3], 4294965504 }
  0x12   :  { %1265 = dma.done.wait [#allocation6], 7296  }
  0x13   :  { %1266 = vsyncadd [#allocation6], 4294960000 }
  0x14   :  { %1267 = dma.done.wait [#allocation9], 1024  }
  0x15   :  { %1268 = vsyncadd [#allocation9], 4294966272  ;;  %v1071_v0 = vld [vmem:[#allocation5 + $0x38] sm:$0xff]  ;;  %v1070_v4 = vld [vmem:[#allocation5 + $0x30] sm:$0xff]  ;;  %vm508_vm0 = vcmask 130048  }
  0x16   :  { %v1079_v1 = vld [vmem:[#allocation5 + $0x78] sm:$0xff]  ;;  %512 = vmatpush.bf16.msra.mxu0 %v1071_v0  ;;  %v1078_v5 = vld [vmem:[#allocation5 + $0x70] sm:$0xff]  ;;  %v1069_v8 = vld [vmem:[#allocation5 + $0x28] sm:$0xff] }
  0x17   :  { %v1087_v2 = vld [vmem:[#allocation5 + $0xb8] sm:$0xff]  ;;  %526 = vmatpush.bf16.msra.mxu1 %v1079_v1  ;;  %v1086_v6 = vld [vmem:[#allocation5 + $0xb0] sm:$0xff]  ;;  %v1077_v9 = vld [vmem:[#allocation5 + $0x68] sm:$0xff] }
  0x18   :  { %v1095_v3 = vld [vmem:[#allocation5 + $0xf8] sm:$0xff]  ;;  %540 = vmatpush.bf16.msra.mxu2 %v1087_v2  ;;  %v1094_v7 = vld [vmem:[#allocation5 + $0xf0] sm:$0xff]  ;;  %v1085_v10 = vld [vmem:[#allocation5 + $0xa8] sm:$0xff] }
  0x19   :  { %554 = vmatpush.bf16.msra.mxu3 %v1095_v3  ;;  %v1093_v11 = vld [vmem:[#allocation5 + $0xe8] sm:$0xff]  ;;  %v1068_v12 = vld [vmem:[#allocation5 + $0x20] sm:$0xff]  ;;  %v1067_v16 = vld [vmem:[#allocation5 + $0x18] sm:$0xff] }
  0x1a   :  { %513 = vmatpush.bf16.msra.mxu0 %v1070_v4  ;;  %v1076_v13 = vld [vmem:[#allocation5 + $0x60] sm:$0xff]  ;;  %v1075_v17 = vld [vmem:[#allocation5 + $0x58] sm:$0xff]  ;;  %v1066_v20 = vld [vmem:[#allocation5 + $0x10] sm:$0xff] }
  0x1b   :  { %527 = vmatpush.bf16.msra.mxu1 %v1078_v5  ;;  %v1084_v14 = vld [vmem:[#allocation5 + $0xa0] sm:$0xff]  ;;  %v1083_v18 = vld [vmem:[#allocation5 + $0x98] sm:$0xff]  ;;  %v1074_v21 = vld [vmem:[#allocation5 + $0x50] sm:$0xff] }
  0x1c   :  { %541 = vmatpush.bf16.msra.mxu2 %v1086_v6  ;;  %v1092_v15 = vld [vmem:[#allocation5 + $0xe0] sm:$0xff]  ;;  %v1091_v19 = vld [vmem:[#allocation5 + $0xd8] sm:$0xff]  ;;  %v1082_v22 = vld [vmem:[#allocation5 + $0x90] sm:$0xff] }
  0x1d   :  { %555 = vmatpush.bf16.msra.mxu3 %v1094_v7  ;;  %v1090_v23 = vld [vmem:[#allocation5 + $0xd0] sm:$0xff]  ;;  %v1065_v24 = vld [vmem:[#allocation5 + $0x8] sm:$0xff]  ;;  %v1064_v28 = vld [vmem:[#allocation5] sm:$0xff] }
  0x1e   :  { %514 = vmatpush.bf16.msra.mxu0 %v1069_v8  ;;  %v1073_v25 = vld [vmem:[#allocation5 + $0x48] sm:$0xff]  ;;  %v1072_v29 = vld [vmem:[#allocation5 + $0x40] sm:$0xff]  ;;  %v91_v30 = vld [vmem:[#allocation2] sm:$0xff] }
  0x1f   :  { %528 = vmatpush.bf16.msra.mxu1 %v1077_v9  ;;  %v1081_v26 = vld [vmem:[#allocation5 + $0x88] sm:$0xff]  ;;  %v92_v32 = vld [vmem:[#allocation2 + $0x8] sm:$0xff]  ;;  %v99_v33 = vld [vmem:[#allocation2 + $0x40] sm:$0xff] }
  0x20   :  { %542 = vmatpush.bf16.msra.mxu2 %v1085_v10  ;;  %v1089_v27 = vld [vmem:[#allocation5 + $0xc8] sm:$0xff]  ;;  %v1103_v34 = vld [vmem:[#allocation5 + $0x138] sm:$0xff]  ;;  %v1080_v36 = vld [vmem:[#allocation5 + $0x80] sm:$0xff]  ;;  %v106_v43 = vpack.c.bf16 %v99_v33, %v92_v32 }
  0x21   :  { %556 = vmatpush.bf16.msra.mxu3 %v1093_v11  ;;  %v98_v31 = vld [vmem:[#allocation2 + $0x38] sm:$0xff]  ;;  %v1111_v35 = vld [vmem:[#allocation5 + $0x178] sm:$0xff]  ;;  %v1088_v37 = vld [vmem:[#allocation5 + $0xc0] sm:$0xff] }
  0x22   :  { %515 = vmatpush.bf16.msra.mxu0 %v1068_v12  ;;  %v93_v38 = vld [vmem:[#allocation2 + $0x10] sm:$0xff]  ;;  %v100_v39 = vld [vmem:[#allocation2 + $0x48] sm:$0xff]  ;;  %v105_v40 = vpack.c.bf16 %v98_v31, %v91_v30  ;;  %v94_v41 = vld [vmem:[#allocation2 + $0x18] sm:$0xff] }
  0x23   :  { %529 = vmatpush.bf16.msra.mxu1 %v1076_v13  ;;  %v101_v42 = vld [vmem:[#allocation2 + $0x50] sm:$0xff]  ;;  %v1102_v45 = vld [vmem:[#allocation5 + $0x130] sm:$0xff]  ;;  %v107_v47 = vpack.c.bf16 %v100_v39, %v93_v38  ;;  %v1101_v49 = vld [vmem:[#allocation5 + $0x128] sm:$0xff] }
  0x24   :  { %543 = vmatpush.bf16.msra.mxu2 %v1084_v14  ;;  %v1112_v44 = vld [vmem:[#allocation5 + $0x180] sm:$0xff]  ;;  %v1110_v46 = vld [vmem:[#allocation5 + $0x170] sm:$0xff]  ;;  %v108_v48 = vpack.c.bf16 %v101_v42, %v94_v41  ;;  %v1109_v50 = vld [vmem:[#allocation5 + $0x168] sm:$0xff] }
  0x25   :  { %557 = vmatpush.bf16.msra.mxu3 %v1092_v15  ;;  %v1100_v51 = vld [vmem:[#allocation5 + $0x120] sm:$0xff]  ;;  %v1099_v53 = vld [vmem:[#allocation5 + $0x118] sm:$0xff]  ;;  %v1098_v57 = vld [vmem:[#allocation5 + $0x110] sm:$0xff] }
  0x26   :  { %516 = vmatpush.bf16.msra.mxu0 %v1067_v16  ;;  %v1108_v52 = vld [vmem:[#allocation5 + $0x160] sm:$0xff]  ;;  %v1107_v54 = vld [vmem:[#allocation5 + $0x158] sm:$0xff]  ;;  %v1106_v58 = vld [vmem:[#allocation5 + $0x150] sm:$0xff] }
  0x27   :  { %530 = vmatpush.bf16.msra.mxu1 %v1075_v17  ;;  %v97_v55 = vld [vmem:[#allocation2 + $0x30] sm:$0xff]  ;;  %v104_v56 = vld [vmem:[#allocation2 + $0x68] sm:$0xff]  ;;  %v1097_v60 = vld [vmem:[#allocation5 + $0x108] sm:$0xff] }
  0x28   :  { %544 = vmatpush.bf16.msra.mxu2 %v1083_v18  ;;  %v111_v59 = vpack.c.bf16 %v104_v56, %v97_v55  ;;  %v1105_v61 = vld [vmem:[#allocation5 + $0x148] sm:$0xff]  ;;  %v1096_v62 = vld [vmem:[#allocation5 + $0x100] sm:$0xff]  ;;  %v95_v0 = vld [vmem:[#allocation2 + $0x20] sm:$0xff] }
  0x29   :  { %558 = vmatpush.bf16.msra.mxu3 %v1091_v19  ;;  %v1104_v63 = vld [vmem:[#allocation5 + $0x140] sm:$0xff]  ;;  %v102_v1 = vld [vmem:[#allocation2 + $0x58] sm:$0xff]  ;;  %v96_v2 = vld [vmem:[#allocation2 + $0x28] sm:$0xff] }
  0x2a   :  { %517 = vmatpush.bf16.msra.mxu0 %v1066_v20  ;;  %v103_v3 = vld [vmem:[#allocation2 + $0x60] sm:$0xff]  ;;  %v109_v4 = vpack.c.bf16 %v102_v1, %v95_v0  ;;  %v1120_v6 = vld [vmem:[#allocation7 + $0x38] sm:$0xff]  ;;  %v1119_v7 = vld [vmem:[#allocation7 + $0x30] sm:$0xff] }
  0x2b   :  { %531 = vmatpush.bf16.msra.mxu1 %v1074_v21  ;;  %v110_v5 = vpack.c.bf16 %v103_v3, %v96_v2  ;;  %v1118_v8 = vld [vmem:[#allocation7 + $0x28] sm:$0xff]  ;;  %v1117_v9 = vld [vmem:[#allocation7 + $0x20] sm:$0xff]  ;;  %v1116_v10 = vld [vmem:[#allocation7 + $0x18] sm:$0xff] }
  0x2c   :  { %545 = vmatpush.bf16.msra.mxu2 %v1082_v22  ;;  %v1115_v11 = vld [vmem:[#allocation7 + $0x10] sm:$0xff]  ;;  %v1114_v12 = vld [vmem:[#allocation7 + $0x8] sm:$0xff]  ;;  %v1113_v16 = vld [vmem:[#allocation7] sm:$0xff] }
  0x2d   :  { %559 = vmatpush.bf16.msra.mxu3 %v1090_v23  ;;  %v1140_v17 = vld [vmem:[%s1348_s2] ss:$0 sm:$0xff]  ;;  %v1128_v18 = vld [vmem:[#allocation8 + $0x38] sm:$0xff]  ;;  %v1127_v20 = vld [vmem:[#allocation8 + $0x30] sm:$0xff] }
  0x2e   :  { %518 = vmatpush.bf16.msra.mxu0 %v1065_v24  ;;  %v1141_v55 = vld [vmem:[%s1350_s4] ss:$0 sm:$0xff] }
  0x2f   :  { %532 = vmatpush.bf16.msra.mxu1 %v1073_v25  ;;  %v1126_v25 = vld [vmem:[#allocation8 + $0x28] sm:$0xff] }
  0x30   :  { %546 = vmatpush.bf16.msra.mxu2 %v1081_v26 }
  0x31   :  { %560 = vmatpush.bf16.msra.mxu3 %v1089_v27 }
  0x32   :  { %519 = vmatpush.bf16.msra.mxu0 %v1064_v28 }
  0x33   :  { %533 = vmatpush.bf16.msra.mxu1 %v1072_v29  ;;  %v1125_v29 = vld [vmem:[#allocation8 + $0x20] sm:$0xff] }
  0x34   :  { %547 = vmatpush.bf16.msra.mxu2 %v1080_v36 }
  0x35   :  { %561 = vmatpush.bf16.msra.mxu3 %v1088_v37  ;;  %520 = vmatmul.bf16.vlgmr.msra.gmra.mxu0 %v105_v40 }
  0x36   :  { %568 = vmatpush.bf16.msrb.mxu0 %v1103_v34  ;;  %534 = vmatmul.bf16.vlgmr.msra.gmra.mxu1 %v106_v43 }
  0x37   :  { %582 = vmatpush.bf16.msrb.mxu1 %v1111_v35  ;;  %548 = vmatmul.bf16.vlgmr.msra.gmra.mxu2 %v107_v47 }
  0x38   :  { %603 = vmatpush.bf16.msrb.mxu2 %v1112_v44  ;;  %562 = vmatmul.bf16.vlgmr.msra.gmra.mxu3 %v108_v48 }
  0x39   :  { %681 = vmatpush.bf16.msrb.mxu3 %v1120_v6 }
  0x3a   :  { %569 = vmatpush.bf16.msrb.mxu0 %v1102_v45 }
  0x3b   :  { %583 = vmatpush.bf16.msrb.mxu1 %v1110_v46 }
  0x3c   :  { %766 = vmatpush.bf16.msra.mxu2 %v1128_v18 }
  0x3d   :  { %682 = vmatpush.bf16.msrb.mxu3 %v1119_v7 }
  0x3e   :  { %570 = vmatpush.bf16.msrb.mxu0 %v1101_v49 }
  0x3f   :  { %584 = vmatpush.bf16.msrb.mxu1 %v1109_v50  ;;  %v1124_v50 = vld [vmem:[#allocation8 + $0x18] sm:$0xff] }
  0x40   :  { %767 = vmatpush.bf16.msra.mxu2 %v1127_v20 }
  0x41   :  { %683 = vmatpush.bf16.msrb.mxu3 %v1118_v8 }
  0x42   :  { %571 = vmatpush.bf16.msrb.mxu0 %v1100_v51  ;;  %v1123_v51 = vld [vmem:[#allocation8 + $0x10] sm:$0xff] }
  0x43   :  { %585 = vmatpush.bf16.msrb.mxu1 %v1108_v52  ;;  %v1122_v52 = vld [vmem:[#allocation8 + $0x8] sm:$0xff] }
  0x44   :  { %768 = vmatpush.bf16.msra.mxu2 %v1126_v25 }
  0x45   :  { %684 = vmatpush.bf16.msrb.mxu3 %v1117_v9 }
  0x46   :  { %572 = vmatpush.bf16.msrb.mxu0 %v1099_v53  ;;  %v1121_v53 = vld [vmem:[#allocation8] sm:$0xff] }
  0x47   :  { %586 = vmatpush.bf16.msrb.mxu1 %v1107_v54  ;;  %999 = vmatmul.msk.bf16.vlgmr.msrb.gmra.mxu2 %vm508_vm0, %v111_v59 }
  0x48   :  { %769 = vmatpush.bf16.msra.mxu2 %v1125_v29 }
  0x49   :  { %685 = vmatpush.bf16.msrb.mxu3 %v1116_v10 }
  0x4a   :  { %573 = vmatpush.bf16.msrb.mxu0 %v1098_v57 }
  0x4b   :  { %587 = vmatpush.bf16.msrb.mxu1 %v1106_v58 }
  0x4c   :  { %770 = vmatpush.bf16.msra.mxu2 %v1124_v50 }
  0x4d   :  { %686 = vmatpush.bf16.msrb.mxu3 %v1115_v11 }
  0x4e   :  { %574 = vmatpush.bf16.msrb.mxu0 %v1097_v60 }
  0x4f   :  { %588 = vmatpush.bf16.msrb.mxu1 %v1105_v61 }
  0x50   :  { %771 = vmatpush.bf16.msra.mxu2 %v1123_v51 }
  0x51   :  { %687 = vmatpush.bf16.msrb.mxu3 %v1114_v12 }
  0x52   :  { %575 = vmatpush.bf16.msrb.mxu0 %v1096_v62  ;;  %v1142_v62 = vld [vmem:[%s1352_s6] ss:$0 sm:$0xff] }
  0x53   :  { %589 = vmatpush.bf16.msrb.mxu1 %v1104_v63 }
  0x54   :  { %772 = vmatpush.bf16.msra.mxu2 %v1122_v52 }
  0x55   :  { %576 = vmatmul.bf16.vlgmr.msrb.gmra.mxu0 %v109_v4  ;;  %688 = vmatpush.bf16.msrb.mxu3 %v1113_v16 }
  0x56   :  { %590 = vmatmul.bf16.vlgmr.msrb.gmra.mxu1 %v110_v5 }
  0x58   :  { %773 = vmatpush.bf16.msra.mxu2 %v1121_v53 }
  0xb2   :  { %v521_v13 = vpop.f32.mrf.mxu0 }
  0xb3   :  { %v535_v14 = vpop.f32.mrf.mxu1  ;;  %v522_v19 = vadd.f32 %v1140_v17, %v521_v13 }
  0xb5   :  { %v536_v24 = vadd.f32 %v535_v14, %v522_v19 }
  0xba   :  { %v549_v15 = vpop.f32.mrf.mxu2  ;;  %v523_v21 = vpop.f32.mrf.mxu0 }
  0xbb   :  { %v537_v22 = vpop.f32.mrf.mxu1  ;;  %v563_v26 = vpop.f32.mrf.mxu3  ;;  %v524_v27 = vadd.f32 %v1140_v17, %v523_v21  ;;  %v550_v28 = vadd.f32 %v549_v15, %v536_v24 }
  0xbd   :  { %v538_v30 = vadd.f32 %v537_v22, %v524_v27  ;;  %v564_v33 = vadd.f32 %v563_v26, %v550_v28 }
  0xc2   :  { %v551_v23 = vpop.f32.mrf.mxu2 }
  0xc3   :  { %v552_v35 = vadd.f32 %v551_v23, %v538_v30  ;;  %v565_v37 = vpop.f32.mrf.mxu3 }
  0xc5   :  { %v566_v38 = vadd.f32 %v565_v37, %v552_v35 }
  0xca   :  { %v605_v34 = vpop.f32.mrf.mxu2 }
  0xd2   :  { %v577_v31 = vpop.f32.mrf.mxu0  ;;  %v607_v45 = vpop.f32.mrf.mxu2 }
  0xd3   :  { %v591_v32 = vpop.f32.mrf.mxu1  ;;  %v578_v36 = vadd.f32 %v577_v31, %v564_v33 }
  0xd5   :  { %v592_v39 = vadd.f32 %v591_v32, %v578_v36 }
  0xd7   :  { %v606_v43 = vadd.f32 %v605_v34, %v592_v39 }
  0xd9   :  { %v610_v47 = vmax.f32 %v606_v43, 0.0 }
  0xda   :  { %v579_v40 = vpop.f32.mrf.mxu0 }
  0xdb   :  { %v580_v41 = vadd.f32 %v579_v40, %v566_v38  ;;  %v593_v42 = vpop.f32.mrf.mxu1 }
  0xdd   :  { %v594_v44 = vadd.f32 %v593_v42, %v580_v41 }
  0xdf   :  { %v608_v46 = vadd.f32 %v607_v45, %v594_v44 }
  0xe1   :  { %v611_v48 = vmax.f32 %v608_v46, 0.0 }
  0xe3   :  { %v612_v49 = vpack.c.bf16 %v611_v48, %v610_v47 }
  0xe5   :  { %689 = vmatmul.bf16.vlgmr.msrb.gmra.mxu3 %v612_v49 }
 0x168   :  { %v690_v54 = vpop.f32.mrf.mxu3 }
 0x169   :  { %v691_v56 = vadd.f32 %v1141_v55, %v690_v54 }
 0x16b   :  { %v695_v59 = vmax.f32 %v691_v56, 0.0 }
 0x170   :  { %v692_v57 = vpop.f32.mrf.mxu3 }
 0x171   :  { %v693_v58 = vadd.f32 %v1141_v55, %v692_v57 }
 0x173   :  { %v696_v60 = vmax.f32 %v693_v58, 0.0 }
 0x175   :  { %v697_v61 = vpack.c.bf16 %v696_v60, %v695_v59 }
 0x177   :  { %774 = vmatmul.bf16.vlgmr.msra.gmra.mxu2 %v697_v61 }
 0x1fa   :  { %v775_v63 = vpop.f32.mrf.mxu2 }
 0x1fb   :  { %v776_v0 = vadd.f32 %v1142_v62, %v775_v63 }
 0x1fd   :  { %780 = vst [vmem:[#allocation10] sm:$0xff] %v776_v0 }
 0x202   :  { %v777_v1 = vpop.f32.mrf.mxu2 }
 0x203   :  { %v778_v2 = vadd.f32 %v1142_v62, %v777_v1 }
 0x205   :  { %781 = vst [vmem:[#allocation10 + $0x8] sm:$0xff] %v778_v2 }
 0x206   :  { %785 = vsyncadd [#allocation4], 128  ;;  %s788_s27 = sshll.u32 %s1353_s7, 4  ;;  %s1279_s28 = smov [#allocation10]   ;;  %s789_s27 = int_to_ptr.hbm [resolvable:$true] %s788_s27 }
 0x207   :  { %s786_s29 = sshll.u32 %s1279_s28, 4  ;;  %s1280_s30 = smov 128   ;;  %s787_s29 = int_to_ptr.vmem [resolvable:$true] %s786_s29 }
 0x208   :  { %s1281_s8 = smov 8  }
 0x209   :  { %794 = dma.vmem_to_hbm [thread:$0]  %s787_s29, 128, %s789_s27, [#allocation4], %s1280_s30, %s1280_s30, %s1281_s8  }
 0x20a   :  { %1269 = dma.done.wait [#allocation4], 256  }
 0x20b   :  { %1270 = vsyncadd [#allocation4], 4294967040 }
 0x20c   :  { %799 = vsyncpa [#allocation3], 1 }
 0x20d   :  { %800 = vsyncpa [#allocation6], 1 }
 0x20e   :  { %801 = vsyncpa [#allocation9], 1 }
 0x20f   :  { %802 = vsyncpa [#allocation4], 1 }

</bundles_post_ra>
